<compile_context>
chip_gen: v6e
topology: v6e:2x2x1
jax: 0.10.0
libtpu: 0.0.40
codegen_flags: <defaults>
</compile_context>

<pallas_src>
import jax
import jax.numpy as jnp
from jax import lax
from jax.experimental import pallas as pl
from jax.experimental.pallas import tpu as pltpu


def rnn_seq_kernel(pk_ref, x_ref, fcw_ref, fcb_ref, oht_ref, o_ref):
    # pk_ref : (8, H)   rows: 0=w1, 1=w2, 2=ln_gamma, 3=ln_beta, 4=h0, 5-7=pad
    # x_ref  : (T, H)   inputs for every timestep
    # fcw_ref: (H, C)   frozen fc weight (stored transposed)
    # fcb_ref: (1, C)   frozen fc bias
    # oht_ref: (C, K)   client_onehot^T
    # o_ref  : (T, 128) output slab: lanes [0,H) = hx, lanes [H,H+K) = out
    T, H = x_ref.shape
    K = oht_ref.shape[1]

    # Frozen params, resident for all T steps (static row slices: zero cost).
    w1 = pk_ref[0:1, :]
    w2 = pk_ref[1:2, :]
    g = pk_ref[2:3, :]
    b = pk_ref[3:4, :]
    h0 = pk_ref[4:5, :]

    # Zero the full slab once (defines the pad lanes), then stage x * w1 for
    # all T rows in lanes [0, H): one vectorized VPU pass instead of one
    # broadcast-multiply per step inside the serial recurrence.
    o_ref[...] = jnp.zeros_like(o_ref)
    o_ref[:, 0:H] = x_ref[...] * w1

    # Fold frozen fc + one-hot projection once, before the recurrence, so the
    # MXU fill/drain overlaps with the per-step VPU/XLU/EUP work below.
    m = jnp.dot(fcw_ref[...], oht_ref[...],
                preferred_element_type=jnp.float32)          # (H, K)
    bp = jnp.dot(fcb_ref[...], oht_ref[...],
                 preferred_element_type=jnp.float32)         # (1, K)

    inv_h = 1.0 / H

    def step(t, h):
        xw = o_ref[pl.ds(t, 1), 0:H]                         # staged x_t * w1
        hx = jnp.maximum(xw + h * w2, 0.0)                   # gate + relu
        # One-pass LayerNorm stats: var = E[x^2] - mean^2 (safe post-ReLU).
        mean = jnp.sum(hx, axis=-1, keepdims=True) * inv_h
        ex2 = jnp.sum(hx * hx, axis=-1, keepdims=True) * inv_h
        var = ex2 - mean * mean
        hx = (hx - mean) * lax.rsqrt(var + 1e-5)
        hx = hx * g + b
        o_ref[pl.ds(t, 1), 0:H] = hx                         # stash hx row t
        return hx                                            # next hidden state

    lax.fori_loop(0, T, step, h0, unroll=True)

    # Batched projection: all T normalized hidden rows through the MXU at once.
    hx_all = o_ref[:, 0:H]                                   # (T, H)
    o_ref[:, H:H + K] = jnp.dot(hx_all, m,
                                preferred_element_type=jnp.float32) + bp


def rnn_forward_seq(xs, hidden0, client_onehot, params):
    """xs: (T, H), hidden0: (H,), client_onehot: (K, C).
    Runs the module's forward once per timestep (hidden fed forward).
    Returns (hx_all (T, H), out_all (T, K))."""
    T, H = xs.shape
    C = params["fc_w"].shape[1]
    K = client_onehot.shape[0]
    assert H + K <= 128, "output slab layout assumes H + K <= 128"

    packed = jnp.zeros((8, H), jnp.float32)
    packed = packed.at[0].set(params["w1"])
    packed = packed.at[1].set(params["w2"])
    packed = packed.at[2].set(params["ln_g"])
    packed = packed.at[3].set(params["ln_b"])
    packed = packed.at[4].set(hidden0.astype(jnp.float32))

    fcw = params["fc_w"].astype(jnp.float32)                 # (H, C)
    fcb = params["fc_b"].reshape(1, C).astype(jnp.float32)   # (1, C)
    oht = client_onehot.astype(jnp.float32).T                # (C, K)

    vmem = pl.BlockSpec(memory_space=pltpu.MemorySpace.VMEM)
    slab = pl.pallas_call(
        rnn_seq_kernel,
        out_shape=jax.ShapeDtypeStruct((T, 128), jnp.float32),
        in_specs=[vmem] * 5,
        out_specs=vmem,
    )(packed, xs.astype(jnp.float32), fcw, fcb, oht)

    return slab[:, :H], slab[:, H:H + K]


def make_params(key, hidden_shape, all_client_num):
    k1, k2, k3, k4 = jax.random.split(key, 4)
    H, C = hidden_shape, all_client_num
    return {
        # nn.Parameter(torch.randn(...))
        "w1": jax.random.normal(k1, (H,), jnp.float32),
        "w2": jax.random.normal(k2, (H,), jnp.float32),
        # LayerNorm default init: weight=1, bias=0
        "ln_g": jnp.ones((H,), jnp.float32),
        "ln_b": jnp.zeros((H,), jnp.float32),
        # frozen Linear(H, C): deterministic random init (stored transposed (H, C))
        "fc_w": (jax.random.normal(k3, (C, H), jnp.float32) / jnp.sqrt(H)).T,
        "fc_b": jax.random.normal(k4, (C,), jnp.float32) * 0.01,
    }


def rnn_step_ref(x, h, client_onehot, params):
    """Pure-JAX reference for a single module forward (PyTorch semantics)."""
    hx = x * params["w1"] + h * params["w2"]
    hx = jnp.maximum(hx, 0.0)
    mean = jnp.mean(hx)
    var = jnp.mean((hx - mean) ** 2)
    hx = (hx - mean) / jnp.sqrt(var + 1e-5)
    hx = hx * params["ln_g"] + params["ln_b"]
    out = hx @ params["fc_w"] + params["fc_b"]               # (C,)
    out = out[None, :] @ client_onehot.astype(jnp.float32).T  # (1, K)
    return hx, out[0]


if __name__ == "__main__":
    T, H, C, K = 8, 32, 16, 4   # timesteps, hidden/input, all_client_num, onehot rows

    key = jax.random.PRNGKey(0)
    kp, kx, kh, kc = jax.random.split(key, 4)
    params = make_params(kp, H, C)

    xs = jax.random.normal(kx, (T, H), jnp.float32)
    h0 = jax.random.normal(kh, (H,), jnp.float32)
    client_ids = jax.random.randint(kc, (K,), 0, C)
    client_onehot = jax.nn.one_hot(client_ids, C, dtype=jnp.float32)  # (K, C)

    hx_all, out_all = rnn_forward_seq(xs, h0, client_onehot, params)
    jax.block_until_ready((hx_all, out_all))

    # Reference: step the PyTorch-equivalent forward T times, hidden carried.
    h = h0
    hx_ref_rows, out_ref_rows = [], []
    for t in range(T):
        h, o = rnn_step_ref(xs[t], h, client_onehot, params)
        hx_ref_rows.append(h)
        out_ref_rows.append(o)
    hx_ref = jnp.stack(hx_ref_rows)
    out_ref = jnp.stack(out_ref_rows)

    assert hx_all.shape == (T, H) and out_all.shape == (T, K)
    assert jnp.allclose(hx_all, hx_ref, atol=1e-4, rtol=1e-4)
    assert jnp.allclose(out_all, out_ref, atol=1e-3, rtol=1e-3)

    print("KERNEL_OK")
</pallas_src>

<mosaic_0001>
module attributes {stable_mosaic.version = 11 : i64} {
  func.func @rnn_seq_kernel(%arg0: memref<8x32xf32, #tpu.memory_space<vmem>>, %arg1: memref<8x32xf32, #tpu.memory_space<vmem>>, %arg2: memref<32x16xf32, #tpu.memory_space<vmem>>, %arg3: memref<1x16xf32, #tpu.memory_space<vmem>>, %arg4: memref<16x4xf32, #tpu.memory_space<vmem>>, %arg5: memref<8x128xf32, #tpu.memory_space<vmem>>) attributes {dimension_semantics = [], scalar_prefetch = 0 : i64, scratch_operands = 0 : i64, tpu.core_type = #tpu.core_type<tc>} {
    %c0 = arith.constant 0 : index
    %c0_0 = arith.constant 0 : index
    %0 = vector.load %arg0[%c0, %c0_0] : memref<8x32xf32, #tpu.memory_space<vmem>>, vector<1x32xf32>
    %c1 = arith.constant 1 : index
    %c0_1 = arith.constant 0 : index
    %1 = vector.load %arg0[%c1, %c0_1] : memref<8x32xf32, #tpu.memory_space<vmem>>, vector<1x32xf32>
    %c2 = arith.constant 2 : index
    %c0_2 = arith.constant 0 : index
    %2 = vector.load %arg0[%c2, %c0_2] : memref<8x32xf32, #tpu.memory_space<vmem>>, vector<1x32xf32>
    %c3 = arith.constant 3 : index
    %c0_3 = arith.constant 0 : index
    %3 = vector.load %arg0[%c3, %c0_3] : memref<8x32xf32, #tpu.memory_space<vmem>>, vector<1x32xf32>
    %c4 = arith.constant 4 : index
    %c0_4 = arith.constant 0 : index
    %4 = vector.load %arg0[%c4, %c0_4] : memref<8x32xf32, #tpu.memory_space<vmem>>, vector<1x32xf32>
    %cst = arith.constant 0.000000e+00 : f32
    %5 = vector.broadcast %cst : f32 to vector<8x128xf32>
    %c0_5 = arith.constant 0 : index
    %c0_6 = arith.constant 0 : index
    %6 = vector.load %arg5[%c0_5, %c0_6] : memref<8x128xf32, #tpu.memory_space<vmem>>, vector<8x128xf32>
    tpu.vector_store %arg5[%c0_5, %c0_6], %5 {strides = array<i32>} : memref<8x128xf32, #tpu.memory_space<vmem>>, vector<8x128xf32>,
    %c0_7 = arith.constant 0 : index
    %c0_8 = arith.constant 0 : index
    %7 = vector.load %arg1[%c0_7, %c0_8] : memref<8x32xf32, #tpu.memory_space<vmem>>, vector<8x32xf32>
    %8 = vector.broadcast %0 : vector<1x32xf32> to vector<8x32xf32>
    %9 = arith.mulf %7, %8 : vector<8x32xf32>
    %c0_9 = arith.constant 0 : index
    %c0_10 = arith.constant 0 : index
    %10 = vector.load %arg5[%c0_9, %c0_10] : memref<8x128xf32, #tpu.memory_space<vmem>>, vector<8x32xf32>
    tpu.vector_store %arg5[%c0_9, %c0_10], %9 {strides = array<i32>} : memref<8x128xf32, #tpu.memory_space<vmem>>, vector<8x32xf32>,
    %c0_11 = arith.constant 0 : index
    %c0_12 = arith.constant 0 : index
    %11 = vector.load %arg2[%c0_11, %c0_12] : memref<32x16xf32, #tpu.memory_space<vmem>>, vector<32x16xf32>
    %c0_13 = arith.constant 0 : index
    %c0_14 = arith.constant 0 : index
    %12 = vector.load %arg4[%c0_13, %c0_14] : memref<16x4xf32, #tpu.memory_space<vmem>>, vector<16x4xf32>
    %cst_15 = arith.constant dense<0.000000e+00> : vector<32x4xf32>
    %13 = tpu.matmul %11, %12, %cst_15 {dimension_numbers = #tpu.dot_dimension_numbers<[1], [0], [0], [1], [0, 0, 1, 1], [], []>} : vector<32x16xf32>, vector<16x4xf32>, vector<32x4xf32> -> vector<32x4xf32>
    %c0_16 = arith.constant 0 : index
    %c0_17 = arith.constant 0 : index
    %14 = vector.load %arg3[%c0_16, %c0_17] : memref<1x16xf32, #tpu.memory_space<vmem>>, vector<1x16xf32>
    %c0_18 = arith.constant 0 : index
    %c0_19 = arith.constant 0 : index
    %15 = vector.load %arg4[%c0_18, %c0_19] : memref<16x4xf32, #tpu.memory_space<vmem>>, vector<16x4xf32>
    %cst_20 = arith.constant dense<0.000000e+00> : vector<1x4xf32>
    %16 = tpu.matmul %14, %15, %cst_20 {dimension_numbers = #tpu.dot_dimension_numbers<[1], [0], [0], [1], [0, 0, 1, 1], [], []>} : vector<1x16xf32>, vector<16x4xf32>, vector<1x4xf32> -> vector<1x4xf32>
    %c0_i32 = arith.constant 0 : i32
    %17 = arith.index_cast %c0_i32 : i32 to index
    %c0_21 = arith.constant 0 : index
    %18 = vector.load %arg5[%17, %c0_21] : memref<8x128xf32, #tpu.memory_space<vmem>>, vector<1x32xf32>
    %19 = arith.mulf %4, %1 : vector<1x32xf32>
    %20 = arith.addf %18, %19 : vector<1x32xf32>
    %cst_22 = arith.constant 0.000000e+00 : f32
    %21 = vector.broadcast %cst_22 : f32 to vector<1x32xf32>
    %22 = arith.maximumf %20, %21 : vector<1x32xf32>
    %cst_23 = arith.constant dense<0.000000e+00> : vector<1xf32>
    %23 = vector.multi_reduction <add>, %22, %cst_23 [1] : vector<1x32xf32> to vector<1xf32>
    %24 = vector.shape_cast %23 : vector<1xf32> to vector<1x1xf32>
    %cst_24 = arith.constant 3.125000e-02 : f32
    %25 = vector.broadcast %cst_24 : f32 to vector<1x1xf32>
    %26 = arith.mulf %24, %25 : vector<1x1xf32>
    %27 = arith.mulf %22, %22 : vector<1x32xf32>
    %cst_25 = arith.constant dense<0.000000e+00> : vector<1xf32>
    %28 = vector.multi_reduction <add>, %27, %cst_25 [1] : vector<1x32xf32> to vector<1xf32>
    %29 = vector.shape_cast %28 : vector<1xf32> to vector<1x1xf32>
    %cst_26 = arith.constant 3.125000e-02 : f32
    %30 = vector.broadcast %cst_26 : f32 to vector<1x1xf32>
    %31 = arith.mulf %29, %30 : vector<1x1xf32>
    %32 = arith.mulf %26, %26 : vector<1x1xf32>
    %33 = arith.subf %31, %32 : vector<1x1xf32>
    %34 = vector.broadcast %26 : vector<1x1xf32> to vector<1x32xf32>
    %35 = arith.subf %22, %34 : vector<1x32xf32>
    %cst_27 = arith.constant 9.99999974E-6 : f32
    %36 = vector.broadcast %cst_27 : f32 to vector<1x1xf32>
    %37 = arith.addf %33, %36 : vector<1x1xf32>
    %38 = math.rsqrt %37 : vector<1x1xf32>
    %39 = vector.broadcast %38 : vector<1x1xf32> to vector<1x32xf32>
    %40 = arith.mulf %35, %39 : vector<1x32xf32>
    %41 = arith.mulf %40, %2 : vector<1x32xf32>
    %42 = arith.addf %41, %3 : vector<1x32xf32>
    %43 = arith.index_cast %c0_i32 : i32 to index
    %c0_28 = arith.constant 0 : index
    %44 = vector.load %arg5[%43, %c0_28] : memref<8x128xf32, #tpu.memory_space<vmem>>, vector<1x32xf32>
    tpu.vector_store %arg5[%43, %c0_28], %42 {strides = array<i32>} : memref<8x128xf32, #tpu.memory_space<vmem>>, vector<1x32xf32>,
    %c1_i32 = arith.constant 1 : i32
    %45 = arith.index_cast %c1_i32 : i32 to index
    %c0_29 = arith.constant 0 : index
    %46 = vector.load %arg5[%45, %c0_29] : memref<8x128xf32, #tpu.memory_space<vmem>>, vector<1x32xf32>
    %47 = arith.mulf %42, %1 : vector<1x32xf32>
    %48 = arith.addf %46, %47 : vector<1x32xf32>
    %cst_30 = arith.constant 0.000000e+00 : f32
    %49 = vector.broadcast %cst_30 : f32 to vector<1x32xf32>
    %50 = arith.maximumf %48, %49 : vector<1x32xf32>
    %cst_31 = arith.constant dense<0.000000e+00> : vector<1xf32>
    %51 = vector.multi_reduction <add>, %50, %cst_31 [1] : vector<1x32xf32> to vector<1xf32>
    %52 = vector.shape_cast %51 : vector<1xf32> to vector<1x1xf32>
    %cst_32 = arith.constant 3.125000e-02 : f32
    %53 = vector.broadcast %cst_32 : f32 to vector<1x1xf32>
    %54 = arith.mulf %52, %53 : vector<1x1xf32>
    %55 = arith.mulf %50, %50 : vector<1x32xf32>
    %cst_33 = arith.constant dense<0.000000e+00> : vector<1xf32>
    %56 = vector.multi_reduction <add>, %55, %cst_33 [1] : vector<1x32xf32> to vector<1xf32>
    %57 = vector.shape_cast %56 : vector<1xf32> to vector<1x1xf32>
    %cst_34 = arith.constant 3.125000e-02 : f32
    %58 = vector.broadcast %cst_34 : f32 to vector<1x1xf32>
    %59 = arith.mulf %57, %58 : vector<1x1xf32>
    %60 = arith.mulf %54, %54 : vector<1x1xf32>
    %61 = arith.subf %59, %60 : vector<1x1xf32>
    %62 = vector.broadcast %54 : vector<1x1xf32> to vector<1x32xf32>
    %63 = arith.subf %50, %62 : vector<1x32xf32>
    %cst_35 = arith.constant 9.99999974E-6 : f32
    %64 = vector.broadcast %cst_35 : f32 to vector<1x1xf32>
    %65 = arith.addf %61, %64 : vector<1x1xf32>
    %66 = math.rsqrt %65 : vector<1x1xf32>
    %67 = vector.broadcast %66 : vector<1x1xf32> to vector<1x32xf32>
    %68 = arith.mulf %63, %67 : vector<1x32xf32>
    %69 = arith.mulf %68, %2 : vector<1x32xf32>
    %70 = arith.addf %69, %3 : vector<1x32xf32>
    %71 = arith.index_cast %c1_i32 : i32 to index
    %c0_36 = arith.constant 0 : index
    %72 = vector.load %arg5[%71, %c0_36] : memref<8x128xf32, #tpu.memory_space<vmem>>, vector<1x32xf32>
    tpu.vector_store %arg5[%71, %c0_36], %70 {strides = array<i32>} : memref<8x128xf32, #tpu.memory_space<vmem>>, vector<1x32xf32>,
    %c2_i32 = arith.constant 2 : i32
    %73 = arith.index_cast %c2_i32 : i32 to index
    %c0_37 = arith.constant 0 : index
    %74 = vector.load %arg5[%73, %c0_37] : memref<8x128xf32, #tpu.memory_space<vmem>>, vector<1x32xf32>
    %75 = arith.mulf %70, %1 : vector<1x32xf32>
    %76 = arith.addf %74, %75 : vector<1x32xf32>
    %cst_38 = arith.constant 0.000000e+00 : f32
    %77 = vector.broadcast %cst_38 : f32 to vector<1x32xf32>
    %78 = arith.maximumf %76, %77 : vector<1x32xf32>
    %cst_39 = arith.constant dense<0.000000e+00> : vector<1xf32>
    %79 = vector.multi_reduction <add>, %78, %cst_39 [1] : vector<1x32xf32> to vector<1xf32>
    %80 = vector.shape_cast %79 : vector<1xf32> to vector<1x1xf32>
    %cst_40 = arith.constant 3.125000e-02 : f32
    %81 = vector.broadcast %cst_40 : f32 to vector<1x1xf32>
    %82 = arith.mulf %80, %81 : vector<1x1xf32>
    %83 = arith.mulf %78, %78 : vector<1x32xf32>
    %cst_41 = arith.constant dense<0.000000e+00> : vector<1xf32>
    %84 = vector.multi_reduction <add>, %83, %cst_41 [1] : vector<1x32xf32> to vector<1xf32>
    %85 = vector.shape_cast %84 : vector<1xf32> to vector<1x1xf32>
    %cst_42 = arith.constant 3.125000e-02 : f32
    %86 = vector.broadcast %cst_42 : f32 to vector<1x1xf32>
    %87 = arith.mulf %85, %86 : vector<1x1xf32>
    %88 = arith.mulf %82, %82 : vector<1x1xf32>
    %89 = arith.subf %87, %88 : vector<1x1xf32>
    %90 = vector.broadcast %82 : vector<1x1xf32> to vector<1x32xf32>
    %91 = arith.subf %78, %90 : vector<1x32xf32>
    %cst_43 = arith.constant 9.99999974E-6 : f32
    %92 = vector.broadcast %cst_43 : f32 to vector<1x1xf32>
    %93 = arith.addf %89, %92 : vector<1x1xf32>
    %94 = math.rsqrt %93 : vector<1x1xf32>
    %95 = vector.broadcast %94 : vector<1x1xf32> to vector<1x32xf32>
    %96 = arith.mulf %91, %95 : vector<1x32xf32>
    %97 = arith.mulf %96, %2 : vector<1x32xf32>
    %98 = arith.addf %97, %3 : vector<1x32xf32>
    %99 = arith.index_cast %c2_i32 : i32 to index
    %c0_44 = arith.constant 0 : index
    %100 = vector.load %arg5[%99, %c0_44] : memref<8x128xf32, #tpu.memory_space<vmem>>, vector<1x32xf32>
    tpu.vector_store %arg5[%99, %c0_44], %98 {strides = array<i32>} : memref<8x128xf32, #tpu.memory_space<vmem>>, vector<1x32xf32>,
    %c3_i32 = arith.constant 3 : i32
    %101 = arith.index_cast %c3_i32 : i32 to index
    %c0_45 = arith.constant 0 : index
    %102 = vector.load %arg5[%101, %c0_45] : memref<8x128xf32, #tpu.memory_space<vmem>>, vector<1x32xf32>
    %103 = arith.mulf %98, %1 : vector<1x32xf32>
    %104 = arith.addf %102, %103 : vector<1x32xf32>
    %cst_46 = arith.constant 0.000000e+00 : f32
    %105 = vector.broadcast %cst_46 : f32 to vector<1x32xf32>
    %106 = arith.maximumf %104, %105 : vector<1x32xf32>
    %cst_47 = arith.constant dense<0.000000e+00> : vector<1xf32>
    %107 = vector.multi_reduction <add>, %106, %cst_47 [1] : vector<1x32xf32> to vector<1xf32>
    %108 = vector.shape_cast %107 : vector<1xf32> to vector<1x1xf32>
    %cst_48 = arith.constant 3.125000e-02 : f32
    %109 = vector.broadcast %cst_48 : f32 to vector<1x1xf32>
    %110 = arith.mulf %108, %109 : vector<1x1xf32>
    %111 = arith.mulf %106, %106 : vector<1x32xf32>
    %cst_49 = arith.constant dense<0.000000e+00> : vector<1xf32>
    %112 = vector.multi_reduction <add>, %111, %cst_49 [1] : vector<1x32xf32> to vector<1xf32>
    %113 = vector.shape_cast %112 : vector<1xf32> to vector<1x1xf32>
    %cst_50 = arith.constant 3.125000e-02 : f32
    %114 = vector.broadcast %cst_50 : f32 to vector<1x1xf32>
    %115 = arith.mulf %113, %114 : vector<1x1xf32>
    %116 = arith.mulf %110, %110 : vector<1x1xf32>
    %117 = arith.subf %115, %116 : vector<1x1xf32>
    %118 = vector.broadcast %110 : vector<1x1xf32> to vector<1x32xf32>
    %119 = arith.subf %106, %118 : vector<1x32xf32>
    %cst_51 = arith.constant 9.99999974E-6 : f32
    %120 = vector.broadcast %cst_51 : f32 to vector<1x1xf32>
    %121 = arith.addf %117, %120 : vector<1x1xf32>
    %122 = math.rsqrt %121 : vector<1x1xf32>
    %123 = vector.broadcast %122 : vector<1x1xf32> to vector<1x32xf32>
    %124 = arith.mulf %119, %123 : vector<1x32xf32>
    %125 = arith.mulf %124, %2 : vector<1x32xf32>
    %126 = arith.addf %125, %3 : vector<1x32xf32>
    %127 = arith.index_cast %c3_i32 : i32 to index
    %c0_52 = arith.constant 0 : index
    %128 = vector.load %arg5[%127, %c0_52] : memref<8x128xf32, #tpu.memory_space<vmem>>, vector<1x32xf32>
    tpu.vector_store %arg5[%127, %c0_52], %126 {strides = array<i32>} : memref<8x128xf32, #tpu.memory_space<vmem>>, vector<1x32xf32>,
    %c4_i32 = arith.constant 4 : i32
    %129 = arith.index_cast %c4_i32 : i32 to index
    %c0_53 = arith.constant 0 : index
    %130 = vector.load %arg5[%129, %c0_53] : memref<8x128xf32, #tpu.memory_space<vmem>>, vector<1x32xf32>
    %131 = arith.mulf %126, %1 : vector<1x32xf32>
    %132 = arith.addf %130, %131 : vector<1x32xf32>
    %cst_54 = arith.constant 0.000000e+00 : f32
    %133 = vector.broadcast %cst_54 : f32 to vector<1x32xf32>
    %134 = arith.maximumf %132, %133 : vector<1x32xf32>
    %cst_55 = arith.constant dense<0.000000e+00> : vector<1xf32>
    %135 = vector.multi_reduction <add>, %134, %cst_55 [1] : vector<1x32xf32> to vector<1xf32>
    %136 = vector.shape_cast %135 : vector<1xf32> to vector<1x1xf32>
    %cst_56 = arith.constant 3.125000e-02 : f32
    %137 = vector.broadcast %cst_56 : f32 to vector<1x1xf32>
    %138 = arith.mulf %136, %137 : vector<1x1xf32>
    %139 = arith.mulf %134, %134 : vector<1x32xf32>
    %cst_57 = arith.constant dense<0.000000e+00> : vector<1xf32>
    %140 = vector.multi_reduction <add>, %139, %cst_57 [1] : vector<1x32xf32> to vector<1xf32>
    %141 = vector.shape_cast %140 : vector<1xf32> to vector<1x1xf32>
    %cst_58 = arith.constant 3.125000e-02 : f32
    %142 = vector.broadcast %cst_58 : f32 to vector<1x1xf32>
    %143 = arith.mulf %141, %142 : vector<1x1xf32>
    %144 = arith.mulf %138, %138 : vector<1x1xf32>
    %145 = arith.subf %143, %144 : vector<1x1xf32>
    %146 = vector.broadcast %138 : vector<1x1xf32> to vector<1x32xf32>
    %147 = arith.subf %134, %146 : vector<1x32xf32>
    %cst_59 = arith.constant 9.99999974E-6 : f32
    %148 = vector.broadcast %cst_59 : f32 to vector<1x1xf32>
    %149 = arith.addf %145, %148 : vector<1x1xf32>
    %150 = math.rsqrt %149 : vector<1x1xf32>
    %151 = vector.broadcast %150 : vector<1x1xf32> to vector<1x32xf32>
    %152 = arith.mulf %147, %151 : vector<1x32xf32>
    %153 = arith.mulf %152, %2 : vector<1x32xf32>
    %154 = arith.addf %153, %3 : vector<1x32xf32>
    %155 = arith.index_cast %c4_i32 : i32 to index
    %c0_60 = arith.constant 0 : index
    %156 = vector.load %arg5[%155, %c0_60] : memref<8x128xf32, #tpu.memory_space<vmem>>, vector<1x32xf32>
    tpu.vector_store %arg5[%155, %c0_60], %154 {strides = array<i32>} : memref<8x128xf32, #tpu.memory_space<vmem>>, vector<1x32xf32>,
    %c5_i32 = arith.constant 5 : i32
    %157 = arith.index_cast %c5_i32 : i32 to index
    %c0_61 = arith.constant 0 : index
    %158 = vector.load %arg5[%157, %c0_61] : memref<8x128xf32, #tpu.memory_space<vmem>>, vector<1x32xf32>
    %159 = arith.mulf %154, %1 : vector<1x32xf32>
    %160 = arith.addf %158, %159 : vector<1x32xf32>
    %cst_62 = arith.constant 0.000000e+00 : f32
    %161 = vector.broadcast %cst_62 : f32 to vector<1x32xf32>
    %162 = arith.maximumf %160, %161 : vector<1x32xf32>
    %cst_63 = arith.constant dense<0.000000e+00> : vector<1xf32>
    %163 = vector.multi_reduction <add>, %162, %cst_63 [1] : vector<1x32xf32> to vector<1xf32>
    %164 = vector.shape_cast %163 : vector<1xf32> to vector<1x1xf32>
    %cst_64 = arith.constant 3.125000e-02 : f32
    %165 = vector.broadcast %cst_64 : f32 to vector<1x1xf32>
    %166 = arith.mulf %164, %165 : vector<1x1xf32>
    %167 = arith.mulf %162, %162 : vector<1x32xf32>
    %cst_65 = arith.constant dense<0.000000e+00> : vector<1xf32>
    %168 = vector.multi_reduction <add>, %167, %cst_65 [1] : vector<1x32xf32> to vector<1xf32>
    %169 = vector.shape_cast %168 : vector<1xf32> to vector<1x1xf32>
    %cst_66 = arith.constant 3.125000e-02 : f32
    %170 = vector.broadcast %cst_66 : f32 to vector<1x1xf32>
    %171 = arith.mulf %169, %170 : vector<1x1xf32>
    %172 = arith.mulf %166, %166 : vector<1x1xf32>
    %173 = arith.subf %171, %172 : vector<1x1xf32>
    %174 = vector.broadcast %166 : vector<1x1xf32> to vector<1x32xf32>
    %175 = arith.subf %162, %174 : vector<1x32xf32>
    %cst_67 = arith.constant 9.99999974E-6 : f32
    %176 = vector.broadcast %cst_67 : f32 to vector<1x1xf32>
    %177 = arith.addf %173, %176 : vector<1x1xf32>
    %178 = math.rsqrt %177 : vector<1x1xf32>
    %179 = vector.broadcast %178 : vector<1x1xf32> to vector<1x32xf32>
    %180 = arith.mulf %175, %179 : vector<1x32xf32>
    %181 = arith.mulf %180, %2 : vector<1x32xf32>
    %182 = arith.addf %181, %3 : vector<1x32xf32>
    %183 = arith.index_cast %c5_i32 : i32 to index
    %c0_68 = arith.constant 0 : index
    %184 = vector.load %arg5[%183, %c0_68] : memref<8x128xf32, #tpu.memory_space<vmem>>, vector<1x32xf32>
    tpu.vector_store %arg5[%183, %c0_68], %182 {strides = array<i32>} : memref<8x128xf32, #tpu.memory_space<vmem>>, vector<1x32xf32>,
    %c6_i32 = arith.constant 6 : i32
    %185 = arith.index_cast %c6_i32 : i32 to index
    %c0_69 = arith.constant 0 : index
    %186 = vector.load %arg5[%185, %c0_69] : memref<8x128xf32, #tpu.memory_space<vmem>>, vector<1x32xf32>
    %187 = arith.mulf %182, %1 : vector<1x32xf32>
    %188 = arith.addf %186, %187 : vector<1x32xf32>
    %cst_70 = arith.constant 0.000000e+00 : f32
    %189 = vector.broadcast %cst_70 : f32 to vector<1x32xf32>
    %190 = arith.maximumf %188, %189 : vector<1x32xf32>
    %cst_71 = arith.constant dense<0.000000e+00> : vector<1xf32>
    %191 = vector.multi_reduction <add>, %190, %cst_71 [1] : vector<1x32xf32> to vector<1xf32>
    %192 = vector.shape_cast %191 : vector<1xf32> to vector<1x1xf32>
    %cst_72 = arith.constant 3.125000e-02 : f32
    %193 = vector.broadcast %cst_72 : f32 to vector<1x1xf32>
    %194 = arith.mulf %192, %193 : vector<1x1xf32>
    %195 = arith.mulf %190, %190 : vector<1x32xf32>
    %cst_73 = arith.constant dense<0.000000e+00> : vector<1xf32>
    %196 = vector.multi_reduction <add>, %195, %cst_73 [1] : vector<1x32xf32> to vector<1xf32>
    %197 = vector.shape_cast %196 : vector<1xf32> to vector<1x1xf32>
    %cst_74 = arith.constant 3.125000e-02 : f32
    %198 = vector.broadcast %cst_74 : f32 to vector<1x1xf32>
    %199 = arith.mulf %197, %198 : vector<1x1xf32>
    %200 = arith.mulf %194, %194 : vector<1x1xf32>
    %201 = arith.subf %199, %200 : vector<1x1xf32>
    %202 = vector.broadcast %194 : vector<1x1xf32> to vector<1x32xf32>
    %203 = arith.subf %190, %202 : vector<1x32xf32>
    %cst_75 = arith.constant 9.99999974E-6 : f32
    %204 = vector.broadcast %cst_75 : f32 to vector<1x1xf32>
    %205 = arith.addf %201, %204 : vector<1x1xf32>
    %206 = math.rsqrt %205 : vector<1x1xf32>
    %207 = vector.broadcast %206 : vector<1x1xf32> to vector<1x32xf32>
    %208 = arith.mulf %203, %207 : vector<1x32xf32>
    %209 = arith.mulf %208, %2 : vector<1x32xf32>
    %210 = arith.addf %209, %3 : vector<1x32xf32>
    %211 = arith.index_cast %c6_i32 : i32 to index
    %c0_76 = arith.constant 0 : index
    %212 = vector.load %arg5[%211, %c0_76] : memref<8x128xf32, #tpu.memory_space<vmem>>, vector<1x32xf32>
    tpu.vector_store %arg5[%211, %c0_76], %210 {strides = array<i32>} : memref<8x128xf32, #tpu.memory_space<vmem>>, vector<1x32xf32>,
    %c7_i32 = arith.constant 7 : i32
    %213 = arith.index_cast %c7_i32 : i32 to index
    %c0_77 = arith.constant 0 : index
    %214 = vector.load %arg5[%213, %c0_77] : memref<8x128xf32, #tpu.memory_space<vmem>>, vector<1x32xf32>
    %215 = arith.mulf %210, %1 : vector<1x32xf32>
    %216 = arith.addf %214, %215 : vector<1x32xf32>
    %cst_78 = arith.constant 0.000000e+00 : f32
    %217 = vector.broadcast %cst_78 : f32 to vector<1x32xf32>
    %218 = arith.maximumf %216, %217 : vector<1x32xf32>
    %cst_79 = arith.constant dense<0.000000e+00> : vector<1xf32>
    %219 = vector.multi_reduction <add>, %218, %cst_79 [1] : vector<1x32xf32> to vector<1xf32>
    %220 = vector.shape_cast %219 : vector<1xf32> to vector<1x1xf32>
    %cst_80 = arith.constant 3.125000e-02 : f32
    %221 = vector.broadcast %cst_80 : f32 to vector<1x1xf32>
    %222 = arith.mulf %220, %221 : vector<1x1xf32>
    %223 = arith.mulf %218, %218 : vector<1x32xf32>
    %cst_81 = arith.constant dense<0.000000e+00> : vector<1xf32>
    %224 = vector.multi_reduction <add>, %223, %cst_81 [1] : vector<1x32xf32> to vector<1xf32>
    %225 = vector.shape_cast %224 : vector<1xf32> to vector<1x1xf32>
    %cst_82 = arith.constant 3.125000e-02 : f32
    %226 = vector.broadcast %cst_82 : f32 to vector<1x1xf32>
    %227 = arith.mulf %225, %226 : vector<1x1xf32>
    %228 = arith.mulf %222, %222 : vector<1x1xf32>
    %229 = arith.subf %227, %228 : vector<1x1xf32>
    %230 = vector.broadcast %222 : vector<1x1xf32> to vector<1x32xf32>
    %231 = arith.subf %218, %230 : vector<1x32xf32>
    %cst_83 = arith.constant 9.99999974E-6 : f32
    %232 = vector.broadcast %cst_83 : f32 to vector<1x1xf32>
    %233 = arith.addf %229, %232 : vector<1x1xf32>
    %234 = math.rsqrt %233 : vector<1x1xf32>
    %235 = vector.broadcast %234 : vector<1x1xf32> to vector<1x32xf32>
    %236 = arith.mulf %231, %235 : vector<1x32xf32>
    %237 = arith.mulf %236, %2 : vector<1x32xf32>
    %238 = arith.addf %237, %3 : vector<1x32xf32>
    %239 = arith.index_cast %c7_i32 : i32 to index
    %c0_84 = arith.constant 0 : index
    %240 = vector.load %arg5[%239, %c0_84] : memref<8x128xf32, #tpu.memory_space<vmem>>, vector<1x32xf32>
    tpu.vector_store %arg5[%239, %c0_84], %238 {strides = array<i32>} : memref<8x128xf32, #tpu.memory_space<vmem>>, vector<1x32xf32>,
    %c8_i32 = arith.constant 8 : i32
    %c0_85 = arith.constant 0 : index
    %c0_86 = arith.constant 0 : index
    %241 = vector.load %arg5[%c0_85, %c0_86] : memref<8x128xf32, #tpu.memory_space<vmem>>, vector<8x32xf32>
    %cst_87 = arith.constant dense<0.000000e+00> : vector<8x4xf32>
    %242 = tpu.matmul %241, %13, %cst_87 {dimension_numbers = #tpu.dot_dimension_numbers<[1], [0], [0], [1], [0, 0, 1, 1], [], []>} : vector<8x32xf32>, vector<32x4xf32>, vector<8x4xf32> -> vector<8x4xf32>
    %243 = vector.broadcast %16 : vector<1x4xf32> to vector<8x4xf32>
    %244 = arith.addf %242, %243 : vector<8x4xf32>
    %c0_88 = arith.constant 0 : index
    %c32 = arith.constant 32 : index
    %245 = vector.load %arg5[%c0_88, %c32] : memref<8x128xf32, #tpu.memory_space<vmem>>, vector<8x4xf32>
    tpu.vector_store %arg5[%c0_88, %c32], %244 {strides = array<i32>} : memref<8x128xf32, #tpu.memory_space<vmem>>, vector<8x4xf32>,
    return
  }
}

</mosaic_0001>

<bundles_post_ra>
// kernel: tpu_custom_call.1
= control target key start
LH: loop header
LB: loop body
LE: loop exit
PB: predicated region body
PF: predicated region fallthrough
CT: control target
= control target key end

     0   :  { %vm33_vm0 = vcmask 261120   ;;  %s725_s0 = inlined_call_operand.vmem [shape: f32[8,32], index: 0, kind: input, shape index: {}]   ;;  %s726_s1 = inlined_call_operand.vmem [shape: f32[8,32], index: 1, kind: input, shape index: {}]   ;;  %s727_s2 = inlined_call_operand.vmem [shape: f32[32,16], index: 2, kind: input, shape index: {}]   ;;  %s728_s3 = inlined_call_operand.vmem [shape: f32[1,16], index: 3, kind: input, shape index: {}]   ;;  %s729_s4 = inlined_call_operand.vmem [shape: f32[16,4], index: 4, kind: input, shape index: {}]   ;;  %s730_s5 = inlined_call_operand.hbm [shape: f32[8,128], index: 5, kind: output, shape index: {}]  }
   0x1   :  { %v488_v0 = vld [vmem:[%s725_s0] ss:$0 sm:$0xff] }
   0x2   :  { %v27_v1 = vld [vmem:[%s726_s1] sm:$0xff] }
   0x3   :  { %10 = vsyncpa [#allocation3], 0  ;;  %v579_v2 = vmov 0.0   ;;  %v32_v3 = vmul.f32 %v488_v0, %v27_v1  ;;  %v625_v4 = vld [vmem:[%s725_s0 + $0x1] sm:$0x1]  ;;  %vm217_vm1 = vcmask 253952  }
   0x4   :  { %26 = vst [vmem:[#allocation2] sm:$0xff] %v579_v2  ;;  %519 = vmatprep.subr.mxu1 %v579_v2  ;;  %v25_v5 = vld [vmem:[%s725_s0 + $0x4] sm:$0x1]  ;;  %v636_v22 = vld [vmem:[%s725_s0 + $0x2] sm:$0x1]  ;;  %vm41_vm2 = vcmask 130048  }
   0x5   :  { %34 = vst.msk [vmem:[#allocation2] sm:$0xff] %vm33_vm0, %v32_v3  ;;  %v214_v6 = vmul.f32 %v25_v5, %v625_v4  ;;  %v641_v24 = vld [vmem:[%s725_s0 + $0x3] sm:$0x1]  ;;  %vm580_vm3 = vmmov 0   ;;  %s582_s15 = smov [#allocation2]   ;;  %vm472_vm4 = vcmask 294144  }
   0x6   :  { %523 = vmatprep.mubr.msk.f32.mxu1 %vm580_vm3, %v579_v2  ;;  %s480_s16 = sshll.u32 %s582_s15, 4  ;;  %s481_s16 = int_to_ptr.vmem [resolvable:$true] %s480_s16 }
   0x7   :  { %s557_s17 = scalar_lea.vmem %s481_s16, 128  ;;  %p562_p1 = scmp.lt.s32.totalorder %s481_s16, %s481_s16 }
   0x8   :  { %p558_p0 = scmp.ne.s32.totalorder %s481_s16, %s557_s17  ;;  %p563_p2 = scmp.lt.s32.totalorder %s557_s17, %s557_s17 }
   0xa   :  { %p564_p3 = por %p563_p2, %p562_p1 }
   0xc   :  { %v213_v7 = vld [vmem:[#allocation2] sm:$0x1]  ;;  %v236_v27 = vld [vmem:[#allocation2 + $0x1] sm:$0x1]  ;;  %v258_v46 = vld [vmem:[#allocation2 + $0x2] sm:$0x1]  ;;  %p565_p4 = pnand %p564_p3, %p558_p0 }
   0xd   :  { %v215_v8 = vadd.f32 %v214_v6, %v213_v7  ;;  %v280_v1 = vld [vmem:[#allocation2 + $0x3] sm:$0x1] }
   0xf   :  { %v216_v9 = vmax.f32 %v215_v8, 0.0 }
  0x11   :  { %v218_v10 = vsel %vm217_vm1, %v216_v9, 0.0  ;;  %v222_v11 = vmul.f32 %v216_v9, %v216_v9 }
  0x12   :  { %219 = vadd.xlane.f32.xlu0 %v218_v10 }
  0x13   :  { %v223_v12 = vsel %vm217_vm1, %v222_v11, 0.0 }
  0x16   :  { %224 = vadd.xlane.f32.xlu0 %v223_v12 }
  0x9b   :  { %v220_v13 = vpop.xlane.xlu0 %219 }
  0x9c   :  { %v221_v14 = vmul.f32 0.03125, %v220_v13 }
  0x9e   :  { %v227_v16 = vmul.f32 %v221_v14, %v221_v14  ;;  %v229_v20 = vsub.f32 %v216_v9, %v221_v14 }
  0x9f   :  { %v225_v15 = vpop.xlane.xlu0 %224 }
  0xa0   :  { %v226_v17 = vmul.f32 0.03125, %v225_v15 }
  0xa2   :  { %v228_v18 = vsub.f32 %v226_v17, %v227_v16 }
  0xa4   :  { %v230_v19 = vadd.f32 1e-05, %v228_v18 }
  0xa6   :  { %541 = vrsqrt.f32 %v230_v19 }
  0xb3   :  { %v542_v21 = vpop.eup %541 }
  0xb4   :  { %v232_v23 = vmul.f32 %v542_v21, %v229_v20 }
  0xb6   :  { %v233_v25 = vmul.f32 %v232_v23, %v636_v22  ;;  %v302_v23 = vld [vmem:[#allocation2 + $0x4] sm:$0x1] }
  0xb8   :  { %v234_v26 = vadd.f32 %v233_v25, %v641_v24 }
  0xba   :  { %v237_v28 = vmul.f32 %v234_v26, %v625_v4  ;;  %235 = vst.msk [vmem:[#allocation2] sm:$0x1] %vm217_vm1, %v234_v26 }
  0xbc   :  { %v238_v29 = vadd.f32 %v237_v28, %v236_v27 }
  0xbe   :  { %v239_v30 = vmax.f32 %v238_v29, 0.0 }
  0xc0   :  { %v240_v31 = vsel %vm217_vm1, %v239_v30, 0.0  ;;  %v244_v32 = vmul.f32 %v239_v30, %v239_v30 }
  0xc1   :  { %241 = vadd.xlane.f32.xlu1 %v240_v31 }
  0xc2   :  { %v245_v33 = vsel %vm217_vm1, %v244_v32, 0.0 }
  0xc5   :  { %246 = vadd.xlane.f32.xlu1 %v245_v33 }
 0x14a   :  { %v242_v34 = vpop.xlane.xlu1 %241 }
 0x14b   :  { %v243_v35 = vmul.f32 0.03125, %v242_v34 }
 0x14d   :  { %v249_v37 = vmul.f32 %v243_v35, %v243_v35  ;;  %v251_v41 = vsub.f32 %v239_v30, %v243_v35 }
 0x14e   :  { %v247_v36 = vpop.xlane.xlu1 %246 }
 0x14f   :  { %v248_v38 = vmul.f32 0.03125, %v247_v36 }
 0x151   :  { %v250_v39 = vsub.f32 %v248_v38, %v249_v37 }
 0x153   :  { %v252_v40 = vadd.f32 1e-05, %v250_v39 }
 0x155   :  { %543 = vrsqrt.f32 %v252_v40 }
 0x162   :  { %v544_v42 = vpop.eup %543 }
 0x163   :  { %v254_v43 = vmul.f32 %v544_v42, %v251_v41 }
 0x165   :  { %v255_v44 = vmul.f32 %v254_v43, %v636_v22  ;;  %v324_v43 = vld [vmem:[#allocation2 + $0x5] sm:$0x1] }
 0x167   :  { %v256_v45 = vadd.f32 %v255_v44, %v641_v24 }
 0x169   :  { %v259_v47 = vmul.f32 %v256_v45, %v625_v4  ;;  %257 = vst.msk [vmem:[#allocation2 + $0x1] sm:$0x1] %vm217_vm1, %v256_v45 }
 0x16b   :  { %v260_v48 = vadd.f32 %v259_v47, %v258_v46 }
 0x16d   :  { %v261_v49 = vmax.f32 %v260_v48, 0.0 }
 0x16f   :  { %v262_v50 = vsel %vm217_vm1, %v261_v49, 0.0  ;;  %v266_v51 = vmul.f32 %v261_v49, %v261_v49 }
 0x170   :  { %263 = vadd.xlane.f32.xlu0 %v262_v50  ;;  %v40_v50 = vld [vmem:[%s729_s4 + $0x8] sm:$0xff] }
 0x171   :  { %v267_v52 = vsel %vm217_vm1, %v266_v51, 0.0  ;;  %v39_v51 = vld [vmem:[%s729_s4] sm:$0xff]  ;;  %509 = vmatprep.subr.mxu0 %v40_v50  ;;  %520 = vmatpush3.msra.mxu1 %v40_v50 }
 0x172   :  { %268 = vadd.xlane.f32.xlu1 %v267_v52  ;;  %v35_v52 = vld [vmem:[%s727_s2] sm:$0xff]  ;;  %510 = vmatpush3.msra.mxu0 %v40_v50 }
 0x173   :  { %513 = vmatprep.mubr.msk.f32.mxu0 %vm41_vm2, %v35_v52  ;;  %511 = vmatprep.subr.mxu0 %v39_v51  ;;  %v391_v52 = vlaneseq }
 0x174   :  { %521 = vmatprep.subr.mxu1 %v579_v2  ;;  %512 = vmatpush3.msra.mxu0 %v39_v51 }
 0x175   :  { %522 = vmatpush3.msra.mxu1 %v39_v51  ;;  %526 = vmatprep.subr.mxu0 %v579_v2 }
 0x1f9   :  { %v264_v53 = vpop.xlane.xlu0 %263 }
 0x1fa   :  { %v265_v54 = vmul.f32 0.03125, %v264_v53  ;;  %v36_v53 = vld [vmem:[%s727_s2 + $0x8] sm:$0xff] }
 0x1fb   :  { %v269_v55 = vpop.xlane.xlu1 %268  ;;  %514 = vmatmul.mubr.msk.f32.vlgmr.msra.gmra.mxu0 %vm41_vm2, %v36_v53  ;;  %v392_v53 = vshrl.u32 %v391_v52, 7 }
 0x1fc   :  { %v271_v56 = vmul.f32 %v265_v54, %v265_v54  ;;  %v270_v57 = vmul.f32 0.03125, %v269_v55  ;;  %v273_v60 = vsub.f32 %v261_v49, %v265_v54  ;;  %v37_v54 = vld [vmem:[%s727_s2 + $0x10] sm:$0xff]  ;;  %v38_v55 = vld [vmem:[%s727_s2 + $0x18] sm:$0xff] }
 0x1fd   :  { %516 = vmatprep.mubr.msk.f32.mxu0 %vm41_vm2, %v37_v54  ;;  %v393_v54 = vsub.s32 0, %v392_v53 }
 0x1fe   :  { %v272_v58 = vsub.f32 %v270_v57, %v271_v56 }
 0x1ff   :  { %517 = vmatmul.mubr.msk.f32.gmra.mxu0 %vm41_vm2, %v38_v55 }
 0x200   :  { %v274_v59 = vadd.f32 1e-05, %v272_v58  ;;  %534 = vmatprep.mubr.msk.f32.mxu0 %vm580_vm3, %v579_v2 }
 0x202   :  { %545 = vrsqrt.f32 %v274_v59 }
 0x20f   :  { %v546_v61 = vpop.eup %545 }
 0x210   :  { %v276_v62 = vmul.f32 %v546_v61, %v273_v60 }
 0x212   :  { %v277_v63 = vmul.f32 %v276_v62, %v636_v22 }
 0x214   :  { %v278_v0 = vadd.f32 %v277_v63, %v641_v24 }
 0x216   :  { %v281_v3 = vmul.f32 %v278_v0, %v625_v4  ;;  %279 = vst.msk [vmem:[#allocation2 + $0x2] sm:$0x1] %vm217_vm1, %v278_v0 }
 0x218   :  { %v282_v5 = vadd.f32 %v281_v3, %v280_v1 }
 0x21a   :  { %v283_v6 = vmax.f32 %v282_v5, 0.0 }
 0x21c   :  { %v284_v7 = vsel %vm217_vm1, %v283_v6, 0.0  ;;  %v288_v8 = vmul.f32 %v283_v6, %v283_v6 }
 0x21d   :  { %285 = vadd.xlane.f32.xlu0 %v284_v7 }
 0x21e   :  { %v289_v9 = vsel %vm217_vm1, %v288_v8, 0.0 }
 0x21f   :  { %290 = vadd.xlane.f32.xlu1 %v289_v9 }
 0x2a6   :  { %v286_v10 = vpop.xlane.xlu0 %285 }
 0x2a7   :  { %v287_v11 = vmul.f32 0.03125, %v286_v10 }
 0x2a8   :  { %v291_v12 = vpop.xlane.xlu1 %290 }
 0x2a9   :  { %v293_v13 = vmul.f32 %v287_v11, %v287_v11  ;;  %v292_v14 = vmul.f32 0.03125, %v291_v12  ;;  %v295_v17 = vsub.f32 %v283_v6, %v287_v11  ;;  %v346_v6 = vld [vmem:[#allocation2 + $0x6] sm:$0x1] }
 0x2ab   :  { %v294_v15 = vsub.f32 %v292_v14, %v293_v13 }
 0x2ad   :  { %v296_v16 = vadd.f32 1e-05, %v294_v15 }
 0x2af   :  { %547 = vrsqrt.f32 %v296_v16 }
 0x2bc   :  { %v548_v18 = vpop.eup %547 }
 0x2bd   :  { %v298_v19 = vmul.f32 %v548_v18, %v295_v17 }
 0x2bf   :  { %v299_v20 = vmul.f32 %v298_v19, %v636_v22 }
 0x2c1   :  { %v300_v21 = vadd.f32 %v299_v20, %v641_v24 }
 0x2c3   :  { %v303_v25 = vmul.f32 %v300_v21, %v625_v4  ;;  %301 = vst.msk [vmem:[#allocation2 + $0x3] sm:$0x1] %vm217_vm1, %v300_v21 }
 0x2c5   :  { %v304_v26 = vadd.f32 %v303_v25, %v302_v23 }
 0x2c7   :  { %v305_v27 = vmax.f32 %v304_v26, 0.0 }
 0x2c9   :  { %v306_v28 = vsel %vm217_vm1, %v305_v27, 0.0  ;;  %v310_v29 = vmul.f32 %v305_v27, %v305_v27 }
 0x2ca   :  { %307 = vadd.xlane.f32.xlu0 %v306_v28 }
 0x2cb   :  { %v311_v30 = vsel %vm217_vm1, %v310_v29, 0.0 }
 0x2cc   :  { %312 = vadd.xlane.f32.xlu1 %v311_v30 }
 0x353   :  { %v308_v31 = vpop.xlane.xlu0 %307 }
 0x354   :  { %v309_v32 = vmul.f32 0.03125, %v308_v31 }
 0x355   :  { %v313_v33 = vpop.xlane.xlu1 %312 }
 0x356   :  { %v315_v34 = vmul.f32 %v309_v32, %v309_v32  ;;  %v314_v35 = vmul.f32 0.03125, %v313_v33  ;;  %v317_v38 = vsub.f32 %v305_v27, %v309_v32  ;;  %v368_v27 = vld [vmem:[#allocation2 + $0x7] sm:$0x1] }
 0x358   :  { %v316_v36 = vsub.f32 %v314_v35, %v315_v34  ;;  %v515_v34 = vpop.f32.mrf.mxu0 }
 0x35a   :  { %v318_v37 = vadd.f32 1e-05, %v316_v36  ;;  %v120_v35 = vpop.f32.mrf.mxu0 }
 0x35c   :  { %549 = vrsqrt.f32 %v318_v37  ;;  %v518_v36 = vpop.f32.mrf.mxu0 }
 0x35d   :  { %527 = vmatpush3.msra.mxu0 %v518_v36 }
 0x35e   :  { %v130_v37 = vpop.f32.mrf.mxu0  ;;  %528 = vmatprep.subr.mxu0 %v579_v2 }
 0x35f   :  { %529 = vmatpush3.msra.mxu0 %v130_v37 }
 0x360   :  { %530 = vmatprep.subr.mxu0 %v579_v2 }
 0x361   :  { %531 = vmatpush3.msra.mxu0 %v515_v34 }
 0x362   :  { %532 = vmatprep.subr.mxu0 %v579_v2 }
 0x363   :  { %533 = vmatpush3.msra.mxu0 %v120_v35 }
 0x369   :  { %v550_v39 = vpop.eup %549 }
 0x36a   :  { %v320_v40 = vmul.f32 %v550_v39, %v317_v38 }
 0x36c   :  { %v321_v41 = vmul.f32 %v320_v40, %v636_v22 }
 0x36e   :  { %v322_v42 = vadd.f32 %v321_v41, %v641_v24 }
 0x370   :  { %v325_v44 = vmul.f32 %v322_v42, %v625_v4  ;;  %323 = vst.msk [vmem:[#allocation2 + $0x4] sm:$0x1] %vm217_vm1, %v322_v42 }
 0x372   :  { %v326_v45 = vadd.f32 %v325_v44, %v324_v43 }
 0x374   :  { %v327_v46 = vmax.f32 %v326_v45, 0.0 }
 0x376   :  { %v328_v47 = vsel %vm217_vm1, %v327_v46, 0.0  ;;  %v332_v48 = vmul.f32 %v327_v46, %v327_v46 }
 0x377   :  { %329 = vadd.xlane.f32.xlu0 %v328_v47 }
 0x378   :  { %v333_v49 = vsel %vm217_vm1, %v332_v48, 0.0 }
 0x379   :  { %334 = vadd.xlane.f32.xlu1 %v333_v49 }
 0x400   :  { %v330_v56 = vpop.xlane.xlu0 %329 }
 0x401   :  { %v331_v57 = vmul.f32 0.03125, %v330_v56 }
 0x402   :  { %v335_v58 = vpop.xlane.xlu1 %334 }
 0x403   :  { %v337_v59 = vmul.f32 %v331_v57, %v331_v57  ;;  %v336_v60 = vmul.f32 0.03125, %v335_v58  ;;  %v339_v63 = vsub.f32 %v327_v46, %v331_v57 }
 0x405   :  { %v338_v61 = vsub.f32 %v336_v60, %v337_v59 }
 0x407   :  { %v340_v62 = vadd.f32 1e-05, %v338_v61 }
 0x409   :  { %551 = vrsqrt.f32 %v340_v62 }
 0x416   :  { %v552_v0 = vpop.eup %551 }
 0x417   :  { %v342_v1 = vmul.f32 %v552_v0, %v339_v63 }
 0x419   :  { %v343_v3 = vmul.f32 %v342_v1, %v636_v22 }
 0x41b   :  { %v344_v5 = vadd.f32 %v343_v3, %v641_v24 }
 0x41d   :  { %v347_v7 = vmul.f32 %v344_v5, %v625_v4  ;;  %345 = vst.msk [vmem:[#allocation2 + $0x5] sm:$0x1] %vm217_vm1, %v344_v5 }
 0x41f   :  { %v348_v8 = vadd.f32 %v347_v7, %v346_v6 }
 0x421   :  { %v349_v9 = vmax.f32 %v348_v8, 0.0 }
 0x423   :  { %v350_v10 = vsel %vm217_vm1, %v349_v9, 0.0  ;;  %v354_v11 = vmul.f32 %v349_v9, %v349_v9 }
 0x424   :  { %351 = vadd.xlane.f32.xlu0 %v350_v10 }
 0x425   :  { %v355_v12 = vsel %vm217_vm1, %v354_v11, 0.0 }
 0x426   :  { %356 = vadd.xlane.f32.xlu1 %v355_v12 }
 0x4ad   :  { %v352_v13 = vpop.xlane.xlu0 %351 }
 0x4ae   :  { %v353_v14 = vmul.f32 0.03125, %v352_v13 }
 0x4af   :  { %v357_v15 = vpop.xlane.xlu1 %356 }
 0x4b0   :  { %v359_v16 = vmul.f32 %v353_v14, %v353_v14  ;;  %v358_v17 = vmul.f32 0.03125, %v357_v15  ;;  %v361_v20 = vsub.f32 %v349_v9, %v353_v14 }
 0x4b2   :  { %v360_v18 = vsub.f32 %v358_v17, %v359_v16 }
 0x4b4   :  { %v362_v19 = vadd.f32 1e-05, %v360_v18 }
 0x4b6   :  { %553 = vrsqrt.f32 %v362_v19 }
 0x4c3   :  { %v554_v21 = vpop.eup %553 }
 0x4c4   :  { %v364_v23 = vmul.f32 %v554_v21, %v361_v20 }
 0x4c6   :  { %v365_v25 = vmul.f32 %v364_v23, %v636_v22 }
 0x4c8   :  { %v366_v26 = vadd.f32 %v365_v25, %v641_v24 }
 0x4ca   :  { %v369_v28 = vmul.f32 %v366_v26, %v625_v4  ;;  %367 = vst.msk [vmem:[#allocation2 + $0x6] sm:$0x1] %vm217_vm1, %v366_v26  ;;  %v139_v4 = vld [vmem:[%s728_s3] sm:$0x1]  ;;  %s581_s3 = smov 32  }
 0x4cb   :  { %524 = vmatmul.mubr.msk.f32.vlgmr.msra.gmra.mxu1 %vm41_vm2, %v139_v4 }
 0x4cc   :  { %v370_v29 = vadd.f32 %v369_v28, %v368_v27 }
 0x4ce   :  { %v371_v30 = vmax.f32 %v370_v29, 0.0 }
 0x4d0   :  { %v372_v31 = vsel %vm217_vm1, %v371_v30, 0.0  ;;  %v376_v32 = vmul.f32 %v371_v30, %v371_v30 }
 0x4d1   :  { %373 = vadd.xlane.f32.xlu0 %v372_v31 }
 0x4d2   :  { %v377_v33 = vsel %vm217_vm1, %v376_v32, 0.0 }
 0x4d3   :  { %378 = vadd.xlane.f32.xlu1 %v377_v33 }
 0x55a   :  { %v374_v38 = vpop.xlane.xlu0 %373 }
 0x55b   :  { %v375_v39 = vmul.f32 0.03125, %v374_v38 }
 0x55c   :  { %v379_v40 = vpop.xlane.xlu1 %378 }
 0x55d   :  { %v381_v41 = vmul.f32 %v375_v39, %v375_v39  ;;  %v380_v42 = vmul.f32 0.03125, %v379_v40  ;;  %v383_v45 = vsub.f32 %v371_v30, %v375_v39 }
 0x55f   :  { %v382_v43 = vsub.f32 %v380_v42, %v381_v41 }
 0x561   :  { %v384_v44 = vadd.f32 1e-05, %v382_v43 }
 0x563   :  { %555 = vrsqrt.f32 %v384_v44 }
 0x570   :  { %v556_v46 = vpop.eup %555 }
 0x571   :  { %v386_v47 = vmul.f32 %v556_v46, %v383_v45 }
 0x573   :  { %v387_v48 = vmul.f32 %v386_v47, %v636_v22 }
 0x575   :  { %v388_v49 = vadd.f32 %v387_v48, %v641_v24 }
 0x577   :  { %389 = vst.msk [vmem:[#allocation2 + $0x7] sm:$0x1] %vm217_vm1, %v388_v49 }
 0x57e   :  { %v390_v2 = vld [vmem:[#allocation2] sm:$0xff] }
 0x57f   :  { %535 = vmatmul.mubr.msk.f32.vlgmr.msra.gmra.mxu0 %vm33_vm0, %v390_v2 }
 0x58b   :  { %v209_v50 = vpop.f32.mrf.mxu1 }
 0x58c   :  { %v394_v55 = vrot.slane %v209_v50, %v393_v54 }
 0x58d   :  { %v525_v51 = vpop.f32.mrf.mxu1 }
 0x63f   :  { %v464_v56 = vpop.f32.mrf.mxu0 }
 0x640   :  { %v465_v57 = vadd.f32 %v464_v56, %v394_v55 }
 0x641   :  { %v536_v58 = vpop.f32.mrf.mxu0 }
 0x642   :  { %469 = vrot.lane.b32.xlu0 %v465_v57, %s581_s3 }
 0x6b4   :  { %v470_v22 = vpop.permute.xlu0 %469 }
 0x6b5   :  { %473 = vst.msk [vmem:[#allocation2] sm:$0xff] %vm472_vm4, %v470_v22 }
 0x6b6   :  { %568 = shalt.err (!%p565_p4)
}
 0x6b7   :  { %483 = dma.vmem_to_hbm [thread:$0]  %s481_s16, 128, %s730_s5, [#allocation3]  }
 0x6b8   :  { %577 = dma.done.wait [#allocation3], 128  }
 0x6b9   :  { %578 = vsyncadd [#allocation3], 4294967168 }
 0x6ba   :  { %487 = vsyncpa [#allocation3], 1 }

</bundles_post_ra>
